<compile_context>
chip_gen: v6e
topology: v6e:2x2x1
jax: 0.10.0
libtpu: 0.0.40
codegen_flags: <defaults>
</compile_context>

<pallas_src>
import jax
import jax.numpy as jnp
from jax.experimental import pallas as pl
from jax.experimental.pallas import tpu as pltpu


def _reciprocal_kernel(x_ref, o_ref):
    x = x_ref[...]
    other = x + x                                    # tensor + tensor
    o_ref[...] = pl.reciprocal(other, approx=False)  # torch.reciprocal(other)


def simple_reciprocal(x: jax.Array) -> jax.Array:
    orig_shape = x.shape

    # Lane-dense 2-D slab: prefer last dim == 128 (full vreg lanes).
    total = x.size
    if total % 128 == 0:
        x2d = x.reshape(-1, 128)
    else:
        # Fallback: keep the last dim as large as possible (still elementwise-correct).
        x2d = x.reshape(orig_shape[0] * orig_shape[1], -1)

    rows, cols = x2d.shape

    # Row tile: (8, 128)-aligned, small grid so v7x can shard across its 2 TCs.
    if rows % 512 == 0:
        tile_r = 512
    elif rows % 8 == 0:
        tile_r = 8
    else:
        tile_r = rows
    grid = (rows // tile_r,)

    out2d = pl.pallas_call(
        _reciprocal_kernel,
        out_shape=jax.ShapeDtypeStruct(x2d.shape, x2d.dtype),
        grid=grid,
        in_specs=[pl.BlockSpec((tile_r, cols), lambda i: (i, 0),
                               memory_space=pltpu.MemorySpace.VMEM)],
        out_specs=pl.BlockSpec((tile_r, cols), lambda i: (i, 0),
                               memory_space=pltpu.MemorySpace.VMEM),
        compiler_params=pltpu.CompilerParams(
            dimension_semantics=("parallel",)),
    )(x2d)
    return out2d.reshape(orig_shape)


if __name__ == "__main__":
    key = jax.random.PRNGKey(0)
    # Keep values away from 0 so reciprocal is well-conditioned for the check.
    x = jax.random.uniform(key, (2, 4, 16, 16), dtype=jnp.float32,
                           minval=0.5, maxval=2.0)

    out = simple_reciprocal(x)
    out = jax.block_until_ready(out)

    ref = 1.0 / (x + x)
    assert out.shape == x.shape and out.dtype == x.dtype
    assert jnp.allclose(out, ref, rtol=1e-6, atol=1e-6)
    print("KERNEL_OK")
</pallas_src>

<mosaic_0001>
module attributes {stable_mosaic.version = 11 : i64} {
  func.func @_reciprocal_kernel(%arg0: i32, %arg1: memref<8x128xf32, #tpu.memory_space<vmem>>, %arg2: memref<8x128xf32, #tpu.memory_space<vmem>>) attributes {dimension_semantics = [#tpu.dimension_semantics<parallel>], iteration_bounds = array<i64: 2>, scalar_prefetch = 0 : i64, scratch_operands = 0 : i64, tpu.core_type = #tpu.core_type<tc>, window_params = [{transform_indices = @transform_0, window_bounds = array<i64: 8, 128>}, {transform_indices = @transform_1, window_bounds = array<i64: 8, 128>}]} {
    %c0 = arith.constant 0 : index
    %c0_0 = arith.constant 0 : index
    %0 = vector.load %arg1[%c0, %c0_0] : memref<8x128xf32, #tpu.memory_space<vmem>>, vector<8x128xf32>
    %1 = arith.addf %0, %0 : vector<8x128xf32>
    %2 = tpu.reciprocal %1 : vector<8x128xf32> -> vector<8x128xf32>
    %c0_1 = arith.constant 0 : index
    %c0_2 = arith.constant 0 : index
    %3 = vector.load %arg2[%c0_1, %c0_2] : memref<8x128xf32, #tpu.memory_space<vmem>>, vector<8x128xf32>
    tpu.vector_store %arg2[%c0_1, %c0_2], %2 {strides = array<i32>} : memref<8x128xf32, #tpu.memory_space<vmem>>, vector<8x128xf32>,
    return
  }
  func.func @transform_0(%arg0: i32) -> (i32, i32) {
    %c0_i32 = arith.constant 0 : i32
    %c0_i32_0 = arith.constant 0 : i32
    return %arg0, %c0_i32 : i32, i32
  }
  func.func @transform_1(%arg0: i32) -> (i32, i32) {
    %c0_i32 = arith.constant 0 : i32
    %c0_i32_0 = arith.constant 0 : i32
    return %arg0, %c0_i32 : i32, i32
  }
}

</mosaic_0001>

<bundles_post_ra>
// kernel: tpu_custom_call.1
= control target key start
LH: loop header
LB: loop body
LE: loop exit
PB: predicated region body
PF: predicated region fallthrough
CT: control target
= control target key end

     0   :  { %6 = vsyncpa [#allocation3], 0  ;;  %s533_s0 = inlined_call_operand.hbm [shape: f32[16,128], index: 0, kind: input, shape index: {}]   ;;  %s534_s1 = inlined_call_operand.hbm [shape: f32[16,128], index: 1, kind: output, shape index: {}]  }
   0x1   :  { %8 = vsyncpa [#allocation3 + $0x1], 0 }
   0x2   :  { %9 = vsyncpa [#allocation4], 0 }
   0x3   :  { %11 = vsyncpa [#allocation4 + $0x1], 0  ;;  %s386_s6 = smov 0   ;;  %s388_s7 = smov 0  }
   0x4   :  { %s390_s8 = smov 0   ;;  %s392_s9 = smov 0  }
   0x5 LB: > { %s407_s10 = sadd.s32 4294967295, %s372_s9   ;;  %s220_s11 = sadd.s32 4294967294, %s372_s9   ;;  %s372_s9 = sphi %s392_s9, %s551_s9   ;;  %s368_s8 = sphi %s390_s8, %s550_s8   ;;  %s364_s7 = sphi %s388_s7, %s549_s7   ;;  %s360_s6 = sphi %s386_s6, %s548_s6  }
   0x6   : > { %s411_s12 = sadd.s32 1, %s372_s9   ;;  %s24_s13 = sadd.s32 1, %s368_s8 }
   0x7   : > { %s21_s14 = ssub.s32 %s372_s9, %s411_s12  ;;  %p31_p0 = scmp.ne.s32.totalorder %s368_s8, %s364_s7 }
   0x8   : > { %p22_p1 = scmp.eq.s32.totalorder %s21_s14, 0  ;;  %p32_p2 = scmp.eq.s32.totalorder %s372_s9, 0 }
   0x9   : > { %p37_p3 = scmp.ne.s32.totalorder %s364_s7, %s360_s6  ;;  %p38_p4 = scmp.eq.s32.totalorder %s407_s10, 0 }
   0xa   : > { %s423_s15 = scalar_select %p22_p1, %s368_s8, %s24_s13  }
   0xb   : > { %p425_p5 = por %p32_p2, %p31_p0  ;;  %p429_p6 = por %p38_p4, %p37_p3 }
   0xc   : > { %p61_p7 = scmp.eq.s32.totalorder %s407_s10, 1  ;;  %p67_p8 = scmp.eq.s32.totalorder %s220_s11, 1 }
   0xd   : > { %s538_s17 = scalar_select %p429_p6, 1, 0 }
   0xe   : > { %p244_p10 = scmp.lt.s32.totalorder %s372_s9, 2  ;;  %p436_p11 = por %p61_p7, %p31_p0 }
   0xf   : > { %p440_p12 = por %p67_p8, %p37_p3  ;;  %s87_s20 = sand.u32 1, %s368_s8  }
  0x10   : > { %s539_s18 = scalar_select %p436_p11, 1, 0 }
  0x11   : > { %s540_s19 = scalar_select %p440_p12, 1, 0 }
  0x12   : > { %s224_s21 = sshll.u32 %s372_s9, 7  ;;  %s223_s22 = sshll.u32 %s87_s20, 3 }
  0x13   : > { %s449_s25 = scalar_lea.hbm %s533_s0, %s224_s21  ;;  %s91_s26 = scalar_lea.vmem [#allocation2], %s223_s22 }
  0x14   : > { %s98_s27 = sshll.u32 %s91_s26, 4  ;;  %p453_p13 = pnand %p244_p10, %p425_p5  ;;  %s457_s27 = int_to_ptr.vmem [resolvable:$true] %s98_s27 }
  0x15   : > { %s88_s29 = scalar_lea.sflag [#allocation3], %s87_s20  ;;  %s280_s30 = scalar_lea.hbm %s449_s25, 128 }
  0x16   : > { %p281_p2 = scmp.ne.s32.totalorder %s449_s25, %s280_s30  ;;  %p282_p3 = pneg %p453_p13 }
  0x17   : > { %s285_s4 = scalar_lea.hbm %s533_s0, 256  ;;  %p286_p5 = scmp.lt.s32.totalorder %s449_s25, %s533_s0 }
  0x18   : > { %p283_p4 = pnand %p282_p3, %p281_p2  ;;  %p287_p8 = scmp.lt.s32.totalorder %s285_s4, %s280_s30 }
  0x1a   : > { %p284_p7 = pneg %p283_p4  ;;  %p288_p10 = por %p287_p8, %p286_p5 }
  0x1c   : > { %p289_p9 = pnand %p288_p10, %p284_p7 }
  0x1e   : > { %292 = shalt.err (!%p289_p9)
}
  0x1f   : > { %s293_s13 = scalar_lea.vmem %s457_s27, 128  ;;  %s374_s14 = smov [#allocation2]  }
  0x20   : > { %p294_p0 = scmp.ne.s32.totalorder %s457_s27, %s293_s13  ;;  %s298_s16 = sshll.u32 %s374_s14, 4  ;;  %s299_s16 = int_to_ptr.vmem [resolvable:$false] %s298_s16 }
  0x21   : > { %s300_s20 = scalar_lea.vmem %s299_s16, 256  ;;  %p301_p4 = scmp.lt.s32.totalorder %s457_s27, %s299_s16 }
  0x22   : > { %p296_p1 = pnand %p294_p0, %p282_p3  ;;  %p302_p12 = scmp.lt.s32.totalorder %s300_s20, %s293_s13 }
  0x24   : > { %p297_p2 = pneg %p296_p1  ;;  %p303_p11 = por %p302_p12, %p301_p4 }
  0x26   : > { %p304_p6 = pnand %p303_p11, %p297_p2 }
  0x28   : > { %307 = shalt.err (!%p304_p6)
}
  0x29   : > { %239 = dma.hbm_to_vmem [thread:$0]  (!%p453_p13), %s449_s25, 128, %s457_s27, %s88_s29  }
  0x2a   : > { %p542_p9 = scmp.lt.s32.totalorder %s372_s9, 3  ;;  %p543_p7 = scmp.ge.s32.totalorder %s372_s9, 1 }
  0x2c   : > { %p104_p0 = pnand %p543_p7, %p542_p9 }
  0x2d   : > { %s484_s21 = sand.u32 (!%p104_p0), 1, %s364_s7   ;;  %p544_p6 = scmp.ne.s32.totalorder (!%p104_p0), %s538_s17, 0 }
  0x2e   : > { %107 = sbr.rel (%p104_p0) target bundleno = 82 (0x52), region = 24  ;;  %s226_s22 = sshll.u32 (!%p104_p0), %s484_s21, 3 }
  0x2f   : > { %s110_s23 = scalar_lea.sflag (!%p104_p0), [#allocation3], %s484_s21  ;;  %s113_s24 = scalar_lea.vmem (!%p104_p0), [#allocation2], %s226_s22 }
  0x33   : > { %351 = dma.done.wait (%p544_p6), %s110_s23, 128  }
  0x34   : > { %353 = vsyncadd (%p544_p6), %s110_s23, 4294967168  ;;  %v132_v0 = vld [vmem:[%s113_s24] sm:$0xff]  ;;  %s131_s25 = scalar_lea.vmem [#allocation5], %s226_s22  ;;  %s229_s27 = sshll.u32 %s407_s10, 7 }
  0x35   : > { %v133_v1 = vadd.f32 %v132_v0, %v132_v0  ;;  %s150_s26 = sshll.u32 %s131_s25, 4  ;;  %s148_s30 = scalar_lea.hbm %s534_s1, %s229_s27  ;;  %s493_s26 = int_to_ptr.vmem [resolvable:$true] %s150_s26 }
  0x36   : > { %s137_s17 = scalar_lea.sflag [#allocation4], %s484_s21  ;;  %s308_s2 = scalar_lea.vmem %s493_s26, 128 }
  0x37   : > { %278 = vrcp.f32 %v133_v1  ;;  %p309_p11 = scmp.ne.s32.totalorder %s493_s26, %s308_s2  ;;  %p545_p12 = scmp.ne.s32.totalorder %s539_s18, 0 }
  0x38   : > { %s375_s3 = smov [#allocation5]  }
  0x39   : > { %p310_p13 = pnand %p309_p11, %p545_p12  ;;  %s312_s4 = sshll.u32 %s375_s3, 4  ;;  %s313_s4 = int_to_ptr.vmem [resolvable:$false] %s312_s4 }
  0x3a   : > { %s314_s10 = scalar_lea.vmem %s313_s4, 256  ;;  %p315_p3 = scmp.lt.s32.totalorder %s493_s26, %s313_s4 }
  0x3b   : > { %p311_p1 = pneg %p310_p13  ;;  %p316_p5 = scmp.lt.s32.totalorder %s314_s10, %s308_s2 }
  0x3d   : > { %p317_p8 = por %p316_p5, %p315_p3 }
  0x3f   : > { %p318_p10 = pnand %p317_p8, %p311_p1 }
  0x44   : > { %v279_v2 = vpop.eup %278 }
  0x45   : > { %135 = vst [vmem:[%s131_s25] sm:$0xff] %v279_v2 }
  0x46   : > { %321 = shalt.err (!%p318_p10)
}
  0x47   : > { %s322_s5 = scalar_lea.hbm %s148_s30, 128  ;;  %s326_s14 = scalar_lea.hbm %s534_s1, 256 }
  0x48   : > { %p323_p2 = scmp.ne.s32.totalorder %s148_s30, %s322_s5  ;;  %p327_p7 = scmp.lt.s32.totalorder %s148_s30, %s534_s1 }
  0x49   : > { %p328_p0 = scmp.lt.s32.totalorder %s326_s14, %s322_s5 }
  0x4a   : > { %p324_p4 = pnand %p323_p2, %p545_p12 }
  0x4b   : > { %p329_p6 = por %p328_p0, %p327_p7 }
  0x4c   : > { %p325_p9 = pneg %p324_p4 }
  0x4e   : > { %p330_p11 = pnand %p329_p6, %p325_p9 }
  0x50   : > { %333 = shalt.err (!%p330_p11)
}
  0x51   : > { %234 = dma.vmem_to_hbm [thread:$0]  (%p545_p12), %s493_s26, 128, %s148_s30, %s137_s17  }
  0x52 PF: > { %s162_s21 = sand.u32 1, %s360_s6   ;;  %p546_p13 = scmp.ne.s32.totalorder %s540_s19, 0 }
  0x53   : > { %p547_p1 = scmp.ge.s32.totalorder %s372_s9, 2  ;;  %s163_s22 = scalar_lea.sflag [#allocation4], %s162_s21 }
  0x55   : > { %p241_p3 = pnand %p547_p1, %p546_p13 }
  0x57   : > { %p242_p5 = pneg %p241_p3 }
  0x59   : > { %355 = dma.done.wait (%p242_p5), %s163_s22, 128  }
  0x5a   : > { %357 = vsyncadd (%p242_p5), %s163_s22, 4294967168  ;;  %p14_p8 = scmp.ge.s32.totalorder %s411_s12, 4   ;;  %s548_s6 = smov %s364_s7 }
  0x5b   : > { %s549_s7 = smov %s368_s8  ;;  %s550_s8 = smov %s423_s15 }
  0x5c   : > { %s551_s9 = smov %s411_s12  ;;  %16 = sbr.rel (!%p14_p8) target bundleno = 5 (0x5), region = 69 }
  0x61   :  { %168 = vsyncpa [#allocation3], 1 }
  0x62   :  { %170 = vsyncpa [#allocation3 + $0x1], 1 }
  0x63   :  { %171 = vsyncpa [#allocation4], 1 }
  0x64   :  { %173 = vsyncpa [#allocation4 + $0x1], 1 }

</bundles_post_ra>
